<compile_context>
chip_gen: v7x
topology: tpu7x:2x2x1
jax: 0.10.0
libtpu: 0.0.40
codegen_flags: <defaults>
</compile_context>

<pallas_src>
import functools

import jax
import jax.numpy as jnp
from jax.experimental import pallas as pl
from jax.experimental.pallas import tpu as pltpu


def _round_up(n, m):
    return -(-n // m) * m


# ---------------------------------------------------------------------------
# Fused kernel: (conv-as-matmul + BN shift + ReLU) -> 3-layer MLP, all on MXU
# ---------------------------------------------------------------------------
def _fused_kernel(x_ref, k_ref, s_ref, w1_ref, b1_ref, w2_ref, b2_ref,
                  w3_ref, b3_ref, o_ref):
    # x_ref : (B_TILE, C*HW)  bf16/f32  -- flat NCHW rows for this batch tile
    # k_ref : (C*HW, HW)      bf16/f32  -- banded conv matrix, BN scale folded
    # s_ref : (1, HW)         f32       -- folded conv-bias + BN shift
    # w*/b* : MLP weights (bf16/f32) and biases (f32); w3/b3 padded to 128 cols
    # o_ref : (B_TILE, 128)   f32
    conv = jnp.dot(x_ref[...], k_ref[...],
                   preferred_element_type=jnp.float32)       # (Bt, HW)
    feat = jnp.maximum(conv + s_ref[...], 0.0)               # BN shift + ReLU

    h1 = jnp.dot(feat.astype(w1_ref.dtype), w1_ref[...],
                 preferred_element_type=jnp.float32) + b1_ref[...]
    h1 = jnp.maximum(h1, 0.0)
    h2 = jnp.dot(h1.astype(w2_ref.dtype), w2_ref[...],
                 preferred_element_type=jnp.float32) + b2_ref[...]
    h2 = jnp.maximum(h2, 0.0)
    out = jnp.dot(h2.astype(w3_ref.dtype), w3_ref[...],
                  preferred_element_type=jnp.float32) + b3_ref[...]
    o_ref[...] = out.astype(o_ref.dtype)


# ---------------------------------------------------------------------------
# One-time parameter folding: conv -> banded matrix, BN fold, padding, casts
# ---------------------------------------------------------------------------
def prepare_mlp_tct_params(params, *, in_channels, height, width,
                           eps=1e-5, matmul_dtype=jnp.bfloat16):
    """Fold conv+BN into a (C*HW, HW) matmul and pre-cast/pad the MLP weights.
    Call once; the result is reused across forward calls."""
    C, H, W = in_channels, height, width
    HW = H * W
    f32 = jnp.float32

    conv_w = jnp.asarray(params["conv_w"], f32).reshape(1, C, 3, 3)
    gamma = jnp.asarray(params["bn_gamma"], f32).reshape(())
    beta = jnp.asarray(params["bn_beta"], f32).reshape(())
    mean = jnp.asarray(params["bn_mean"], f32).reshape(())
    var = jnp.asarray(params["bn_var"], f32).reshape(())
    conv_b = jnp.asarray(params["conv_b"], f32).reshape(())

    scale = gamma * jax.lax.rsqrt(var + eps)
    shift = scale * (conv_b - mean) + beta

    # Banded conv matrix K[c*HW + p_in, p_out] = scale * w[c, kh, kw] when the
    # input flat position p_in feeds output p_out through tap (kh, kw) and the
    # tap is inside the image (padding=1 halo rows stay zero).
    p = jnp.arange(HW)
    h_out = p // W
    w_out = p % W
    rows = p[:, None]                                        # (HW, 1)
    K = jnp.zeros((C, HW, HW), f32)
    for kh in range(3):
        for kw in range(3):
            h_in = h_out + (kh - 1)
            w_in = w_out + (kw - 1)
            valid = (h_in >= 0) & (h_in < H) & (w_in >= 0) & (w_in < W)
            p_in = h_in * W + w_in
            onehot = ((rows == p_in[None, :]) & valid[None, :]).astype(f32)
            K = K + conv_w[0, :, kh, kw][:, None, None] * onehot[None, :, :]
    K = (K * scale).reshape(C * HW, HW).astype(matmul_dtype)

    out_num = params["w3"].shape[1]
    N_pad = _round_up(max(out_num, 128), 128)     # lane-dense unmasked store

    prep = {
        "K": K,
        "shift": jnp.full((1, HW), shift, f32),
        "w1": jnp.asarray(params["w1"], matmul_dtype),            # (HW, 512)
        "b1": jnp.asarray(params["b1"], f32).reshape(1, -1),
        "w2": jnp.asarray(params["w2"], matmul_dtype),            # (512, 128)
        "b2": jnp.asarray(params["b2"], f32).reshape(1, -1),
        "w3": jnp.pad(jnp.asarray(params["w3"], matmul_dtype),
                      ((0, 0), (0, N_pad - out_num))),            # (128, Np)
        "b3": jnp.pad(jnp.asarray(params["b3"], f32).reshape(1, -1),
                      ((0, 0), (0, N_pad - out_num))),            # (1, Np)
        "out_num": int(out_num),
    }
    return prep


# ---------------------------------------------------------------------------
# Forward: single pallas_call, batch-tiled grid, weights VMEM-resident
# ---------------------------------------------------------------------------
def mlp_tct_forward(x, prep, *, b_tile=512):
    """b_tile notes: 512 suits v5e (16 MiB scoped VMEM, 4x128 MXU) and v6e
    (multiple of 256); it is also safely within v7x's 64 MiB VMEM.  Larger
    tiles only matter once B is in the thousands."""
    B, C, H, W = x.shape
    HW = H * W
    CHW = C * HW
    assert prep["K"].shape == (CHW, HW), (prep["K"].shape, (CHW, HW))

    out_num = prep["out_num"]
    n_h1 = prep["w1"].shape[1]
    n_h2 = prep["w2"].shape[1]
    N_pad = prep["w3"].shape[1]
    mm_dtype = prep["K"].dtype

    B_TILE = max(8, min(b_tile, _round_up(B, 8)))
    B_pad = _round_up(B, B_TILE)
    nb = B_pad // B_TILE

    # Pure row-major reshape of NCHW (no transpose, no extra HBM pass).
    x_flat = x.reshape(B, CHW).astype(mm_dtype)
    if B_pad != B:
        x_flat = jnp.pad(x_flat, ((0, B_pad - B), (0, 0)))

    const2d = lambda i: (0, 0)   # weights: same block every step -> DMA once

    flops = 2 * B_pad * (CHW * HW + HW * n_h1 + n_h1 * n_h2 + n_h2 * N_pad)
    bytes_accessed = (
        x_flat.size * x_flat.dtype.itemsize
        + sum(prep[k].size * prep[k].dtype.itemsize
              for k in ("K", "shift", "w1", "b1", "w2", "b2", "w3", "b3"))
        + B_pad * N_pad * 4)

    out_pad = pl.pallas_call(
        _fused_kernel,
        out_shape=jax.ShapeDtypeStruct((B_pad, N_pad), jnp.float32),
        grid_spec=pltpu.PrefetchScalarGridSpec(
            num_scalar_prefetch=0,
            grid=(nb,),
            in_specs=[
                pl.BlockSpec((B_TILE, CHW), lambda i: (i, 0)),   # x tile
                pl.BlockSpec((CHW, HW), const2d),                # conv matrix
                pl.BlockSpec((1, HW), const2d),                  # BN shift
                pl.BlockSpec((HW, n_h1), const2d),               # w1
                pl.BlockSpec((1, n_h1), const2d),                # b1
                pl.BlockSpec((n_h1, n_h2), const2d),             # w2
                pl.BlockSpec((1, n_h2), const2d),                # b2
                pl.BlockSpec((n_h2, N_pad), const2d),            # w3 (padded)
                pl.BlockSpec((1, N_pad), const2d),               # b3 (padded)
            ],
            out_specs=pl.BlockSpec((B_TILE, N_pad), lambda i: (i, 0)),
        ),
        compiler_params=pltpu.CompilerParams(
            dimension_semantics=("parallel",)),
        cost_estimate=pl.CostEstimate(flops=flops, transcendentals=0,
                                      bytes_accessed=bytes_accessed),
    )(x_flat, prep["K"], prep["shift"], prep["w1"], prep["b1"],
      prep["w2"], prep["b2"], prep["w3"], prep["b3"])

    return out_pad[:B, :out_num]


# ---------------------------------------------------------------------------
# Pure-JAX fp32 reference (matches the PyTorch module in eval mode)
# ---------------------------------------------------------------------------
def mlp_tct_reference(x, params, eps=1e-5):
    B = x.shape[0]
    y = jax.lax.conv_general_dilated(
        x.astype(jnp.float32), params["conv_w"].astype(jnp.float32),
        window_strides=(1, 1), padding=((1, 1), (1, 1)),
        dimension_numbers=("NCHW", "OIHW", "NCHW"))
    y = y + jnp.asarray(params["conv_b"], jnp.float32)
    inv_std = jax.lax.rsqrt(jnp.asarray(params["bn_var"], jnp.float32) + eps)
    y = (jnp.asarray(params["bn_gamma"], jnp.float32)
         * (y - jnp.asarray(params["bn_mean"], jnp.float32)) * inv_std
         + jnp.asarray(params["bn_beta"], jnp.float32))
    y = jnp.maximum(y, 0.0).reshape(B, -1)
    h1 = jnp.maximum(y @ params["w1"] + params["b1"], 0.0)
    h2 = jnp.maximum(h1 @ params["w2"] + params["b2"], 0.0)
    return h2 @ params["w3"] + params["b3"]


if __name__ == "__main__":
    # Shapes consistent with the module: conv has 1 output channel, so
    # input_num = H*W; output_num = 2.
    B, C, H, W = 2, 4, 16, 16
    input_num = H * W          # 256
    output_num = 2

    key = jax.random.PRNGKey(0)
    ks = jax.random.split(key, 10)

    x = jax.random.normal(ks[0], (B, C, H, W), jnp.float32)

    # PyTorch Linear stores (out, in) and computes x @ W.T; weights here are
    # stored pre-transposed as (in, out).
    params = {
        "conv_w":  jax.random.normal(ks[1], (1, C, 3, 3), jnp.float32) * 0.1,
        "conv_b":  jnp.float32(0.05),
        "bn_gamma": jnp.float32(1.2),
        "bn_beta":  jnp.float32(-0.1),
        "bn_mean":  jnp.float32(0.03),
        "bn_var":   jnp.float32(0.9),
        "w1": jax.random.normal(ks[2], (input_num, 512), jnp.float32) * 0.05,
        "b1": jax.random.normal(ks[3], (1, 512), jnp.float32) * 0.01,
        "w2": jax.random.normal(ks[4], (512, 128), jnp.float32) * 0.05,
        "b2": jax.random.normal(ks[5], (1, 128), jnp.float32) * 0.01,
        "w3": jax.random.normal(ks[6], (128, output_num), jnp.float32) * 0.05,
        "b3": jax.random.normal(ks[7], (1, output_num), jnp.float32) * 0.01,
    }

    # One-time parameter folding (bf16 matmul operands, fp32 accumulation).
    prep = prepare_mlp_tct_params(params, in_channels=C, height=H, width=W,
                                  matmul_dtype=jnp.bfloat16)

    fwd = jax.jit(lambda xx: mlp_tct_forward(xx, prep))
    out = fwd(x)
    jax.block_until_ready(out)
    assert out.shape == (B, output_num), out.shape

    ref = mlp_tct_reference(x, params)
    max_err = float(jnp.max(jnp.abs(out - ref)))
    assert max_err < 3e-2, f"max |pallas - reference| = {max_err}"

    print("KERNEL_OK")
</pallas_src>

<mosaic_0001>
module attributes {stable_mosaic.version = 11 : i64} {
  func.func @_fused_kernel(%arg0: i32, %arg1: memref<8x1024xbf16, #tpu.memory_space<vmem>>, %arg2: memref<1024x256xbf16, #tpu.memory_space<vmem>>, %arg3: memref<1x256xf32, #tpu.memory_space<vmem>>, %arg4: memref<256x512xbf16, #tpu.memory_space<vmem>>, %arg5: memref<1x512xf32, #tpu.memory_space<vmem>>, %arg6: memref<512x128xbf16, #tpu.memory_space<vmem>>, %arg7: memref<1x128xf32, #tpu.memory_space<vmem>>, %arg8: memref<128x128xbf16, #tpu.memory_space<vmem>>, %arg9: memref<1x128xf32, #tpu.memory_space<vmem>>, %arg10: memref<8x128xf32, #tpu.memory_space<vmem>>) attributes {dimension_semantics = [#tpu.dimension_semantics<parallel>], iteration_bounds = array<i64: 1>, scalar_prefetch = 0 : i64, scratch_operands = 0 : i64, tpu.core_type = #tpu.core_type<tc>, window_params = [{transform_indices = @transform_0, window_bounds = array<i64: 8, 1024>}, {pipeline_mode = #tpu.pipeline_mode<synchronous>, transform_indices = @transform_1, window_bounds = array<i64: 1024, 256>}, {pipeline_mode = #tpu.pipeline_mode<synchronous>, transform_indices = @transform_2, window_bounds = array<i64: 1, 256>}, {pipeline_mode = #tpu.pipeline_mode<synchronous>, transform_indices = @transform_3, window_bounds = array<i64: 256, 512>}, {pipeline_mode = #tpu.pipeline_mode<synchronous>, transform_indices = @transform_4, window_bounds = array<i64: 1, 512>}, {pipeline_mode = #tpu.pipeline_mode<synchronous>, transform_indices = @transform_5, window_bounds = array<i64: 512, 128>}, {pipeline_mode = #tpu.pipeline_mode<synchronous>, transform_indices = @transform_6, window_bounds = array<i64: 1, 128>}, {pipeline_mode = #tpu.pipeline_mode<synchronous>, transform_indices = @transform_7, window_bounds = array<i64: 128, 128>}, {pipeline_mode = #tpu.pipeline_mode<synchronous>, transform_indices = @transform_8, window_bounds = array<i64: 1, 128>}, {transform_indices = @transform_9, window_bounds = array<i64: 8, 128>}]} {
    %c0 = arith.constant 0 : index
    %c0_0 = arith.constant 0 : index
    %0 = vector.load %arg1[%c0, %c0_0] : memref<8x1024xbf16, #tpu.memory_space<vmem>>, vector<8x1024xbf16>
    %c0_1 = arith.constant 0 : index
    %c0_2 = arith.constant 0 : index
    %1 = vector.load %arg2[%c0_1, %c0_2] : memref<1024x256xbf16, #tpu.memory_space<vmem>>, vector<1024x256xbf16>
    %cst = arith.constant dense<0.000000e+00> : vector<8x256xf32>
    %2 = tpu.matmul %0, %1, %cst {dimension_numbers = #tpu.dot_dimension_numbers<[1], [0], [0], [1], [0, 0, 1, 1], [], []>} : vector<8x1024xbf16>, vector<1024x256xbf16>, vector<8x256xf32> -> vector<8x256xf32>
    %c0_3 = arith.constant 0 : index
    %c0_4 = arith.constant 0 : index
    %3 = vector.load %arg3[%c0_3, %c0_4] : memref<1x256xf32, #tpu.memory_space<vmem>>, vector<1x256xf32>
    %4 = vector.broadcast %3 : vector<1x256xf32> to vector<8x256xf32>
    %5 = arith.addf %2, %4 : vector<8x256xf32>
    %cst_5 = arith.constant 0.000000e+00 : f32
    %6 = vector.broadcast %cst_5 : f32 to vector<8x256xf32>
    %7 = arith.maximumf %5, %6 : vector<8x256xf32>
    %8 = arith.truncf %7 : vector<8x256xf32> to vector<8x256xbf16>
    %c0_6 = arith.constant 0 : index
    %c0_7 = arith.constant 0 : index
    %9 = vector.load %arg4[%c0_6, %c0_7] : memref<256x512xbf16, #tpu.memory_space<vmem>>, vector<256x512xbf16>
    %cst_8 = arith.constant dense<0.000000e+00> : vector<8x512xf32>
    %10 = tpu.matmul %8, %9, %cst_8 {dimension_numbers = #tpu.dot_dimension_numbers<[1], [0], [0], [1], [0, 0, 1, 1], [], []>} : vector<8x256xbf16>, vector<256x512xbf16>, vector<8x512xf32> -> vector<8x512xf32>
    %c0_9 = arith.constant 0 : index
    %c0_10 = arith.constant 0 : index
    %11 = vector.load %arg5[%c0_9, %c0_10] : memref<1x512xf32, #tpu.memory_space<vmem>>, vector<1x512xf32>
    %12 = vector.broadcast %11 : vector<1x512xf32> to vector<8x512xf32>
    %13 = arith.addf %10, %12 : vector<8x512xf32>
    %cst_11 = arith.constant 0.000000e+00 : f32
    %14 = vector.broadcast %cst_11 : f32 to vector<8x512xf32>
    %15 = arith.maximumf %13, %14 : vector<8x512xf32>
    %16 = arith.truncf %15 : vector<8x512xf32> to vector<8x512xbf16>
    %c0_12 = arith.constant 0 : index
    %c0_13 = arith.constant 0 : index
    %17 = vector.load %arg6[%c0_12, %c0_13] : memref<512x128xbf16, #tpu.memory_space<vmem>>, vector<512x128xbf16>
    %cst_14 = arith.constant dense<0.000000e+00> : vector<8x128xf32>
    %18 = tpu.matmul %16, %17, %cst_14 {dimension_numbers = #tpu.dot_dimension_numbers<[1], [0], [0], [1], [0, 0, 1, 1], [], []>} : vector<8x512xbf16>, vector<512x128xbf16>, vector<8x128xf32> -> vector<8x128xf32>
    %c0_15 = arith.constant 0 : index
    %c0_16 = arith.constant 0 : index
    %19 = vector.load %arg7[%c0_15, %c0_16] : memref<1x128xf32, #tpu.memory_space<vmem>>, vector<1x128xf32>
    %20 = vector.broadcast %19 : vector<1x128xf32> to vector<8x128xf32>
    %21 = arith.addf %18, %20 : vector<8x128xf32>
    %cst_17 = arith.constant 0.000000e+00 : f32
    %22 = vector.broadcast %cst_17 : f32 to vector<8x128xf32>
    %23 = arith.maximumf %21, %22 : vector<8x128xf32>
    %24 = arith.truncf %23 : vector<8x128xf32> to vector<8x128xbf16>
    %c0_18 = arith.constant 0 : index
    %c0_19 = arith.constant 0 : index
    %25 = vector.load %arg8[%c0_18, %c0_19] : memref<128x128xbf16, #tpu.memory_space<vmem>>, vector<128x128xbf16>
    %cst_20 = arith.constant dense<0.000000e+00> : vector<8x128xf32>
    %26 = tpu.matmul %24, %25, %cst_20 {dimension_numbers = #tpu.dot_dimension_numbers<[1], [0], [0], [1], [0, 0, 1, 1], [], []>} : vector<8x128xbf16>, vector<128x128xbf16>, vector<8x128xf32> -> vector<8x128xf32>
    %c0_21 = arith.constant 0 : index
    %c0_22 = arith.constant 0 : index
    %27 = vector.load %arg9[%c0_21, %c0_22] : memref<1x128xf32, #tpu.memory_space<vmem>>, vector<1x128xf32>
    %28 = vector.broadcast %27 : vector<1x128xf32> to vector<8x128xf32>
    %29 = arith.addf %26, %28 : vector<8x128xf32>
    %c0_23 = arith.constant 0 : index
    %c0_24 = arith.constant 0 : index
    %30 = vector.load %arg10[%c0_23, %c0_24] : memref<8x128xf32, #tpu.memory_space<vmem>>, vector<8x128xf32>
    tpu.vector_store %arg10[%c0_23, %c0_24], %29 {strides = array<i32>} : memref<8x128xf32, #tpu.memory_space<vmem>>, vector<8x128xf32>,
    return
  }
  func.func @transform_0(%arg0: i32) -> (i32, i32) {
    %c0_i32 = arith.constant 0 : i32
    %c0_i32_0 = arith.constant 0 : i32
    return %arg0, %c0_i32 : i32, i32
  }
  func.func @transform_1(%arg0: i32) -> (i32, i32) {
    %c0_i32 = arith.constant 0 : i32
    %c0_i32_0 = arith.constant 0 : i32
    %c0_i32_1 = arith.constant 0 : i32
    return %c0_i32, %c0_i32_0 : i32, i32
  }
  func.func @transform_2(%arg0: i32) -> (i32, i32) {
    %c0_i32 = arith.constant 0 : i32
    %c0_i32_0 = arith.constant 0 : i32
    %c0_i32_1 = arith.constant 0 : i32
    return %c0_i32, %c0_i32_0 : i32, i32
  }
  func.func @transform_3(%arg0: i32) -> (i32, i32) {
    %c0_i32 = arith.constant 0 : i32
    %c0_i32_0 = arith.constant 0 : i32
    %c0_i32_1 = arith.constant 0 : i32
    return %c0_i32, %c0_i32_0 : i32, i32
  }
  func.func @transform_4(%arg0: i32) -> (i32, i32) {
    %c0_i32 = arith.constant 0 : i32
    %c0_i32_0 = arith.constant 0 : i32
    %c0_i32_1 = arith.constant 0 : i32
    return %c0_i32, %c0_i32_0 : i32, i32
  }
  func.func @transform_5(%arg0: i32) -> (i32, i32) {
    %c0_i32 = arith.constant 0 : i32
    %c0_i32_0 = arith.constant 0 : i32
    %c0_i32_1 = arith.constant 0 : i32
    return %c0_i32, %c0_i32_0 : i32, i32
  }
  func.func @transform_6(%arg0: i32) -> (i32, i32) {
    %c0_i32 = arith.constant 0 : i32
    %c0_i32_0 = arith.constant 0 : i32
    %c0_i32_1 = arith.constant 0 : i32
    return %c0_i32, %c0_i32_0 : i32, i32
  }
  func.func @transform_7(%arg0: i32) -> (i32, i32) {
    %c0_i32 = arith.constant 0 : i32
    %c0_i32_0 = arith.constant 0 : i32
    %c0_i32_1 = arith.constant 0 : i32
    return %c0_i32, %c0_i32_0 : i32, i32
  }
  func.func @transform_8(%arg0: i32) -> (i32, i32) {
    %c0_i32 = arith.constant 0 : i32
    %c0_i32_0 = arith.constant 0 : i32
    %c0_i32_1 = arith.constant 0 : i32
    return %c0_i32, %c0_i32_0 : i32, i32
  }
  func.func @transform_9(%arg0: i32) -> (i32, i32) {
    %c0_i32 = arith.constant 0 : i32
    %c0_i32_0 = arith.constant 0 : i32
    return %arg0, %c0_i32 : i32, i32
  }
}

</mosaic_0001>

<bundles_post_ra>
// kernel: _lambda_.1
= control target key start
LH: loop header
LB: loop body
LE: loop exit
PB: predicated region body
PF: predicated region fallthrough
CT: control target
= control target key end

     0   :  { %vm2638_vm0 = vmmov 0   ;;  %s3448_s1 = inlined_call_operand.vmem [shape: bf16[1024,256], index: 1, kind: input, shape index: {}]   ;;  %s3449_s0 = inlined_call_operand.vmem [shape: bf16[8,1024], index: 0, kind: input, shape index: {}]   ;;  %s3450_s3 = inlined_call_operand.vmem [shape: bf16[256,512], index: 3, kind: input, shape index: {}]   ;;  %s3451_s5 = inlined_call_operand.vmem [shape: bf16[512,128], index: 5, kind: input, shape index: {}]   ;;  %s3452_s2 = inlined_call_operand.vmem [shape: f32[1,256], index: 2, kind: input, shape index: {}]   ;;  %s3453_s4 = inlined_call_operand.vmem [shape: f32[1,512], index: 4, kind: input, shape index: {}]   ;;  %s3454_s7 = inlined_call_operand.vmem [shape: bf16[128,128], index: 7, kind: input, shape index: {}]   ;;  %s3455_s6 = inlined_call_operand.vmem [shape: f32[1,128], index: 6, kind: input, shape index: {}]   ;;  %s3456_s8 = inlined_call_operand.vmem [shape: f32[1,128], index: 8, kind: input, shape index: {}]   ;;  %s3457_s9 = inlined_call_operand.vmem [shape: f32[8,128], index: 9, kind: output, shape index: {}]  }
   0x1   :  { %v2301_v0 = vld [vmem:[%s3448_s1 + $0x4] ss:$8 sps:$4 sm:$0xff]   ;;  %v2303_v1 = vld [vmem:[%s3448_s1] ss:$8 sps:$4 sm:$0xff]   ;;  %v2304_v2 = vld [vmem:[%s3448_s1 + $0x14] ss:$8 sps:$4 sm:$0xff]  }
   0x2   :  { %845 = vmatprep.subr.bf16.mxu0 %v2301_v0  ;;  %v2306_v3 = vld [vmem:[%s3448_s1 + $0x10] ss:$8 sps:$4 sm:$0xff]   ;;  %v2307_v4 = vld [vmem:[%s3448_s1 + $0x24] ss:$8 sps:$4 sm:$0xff]   ;;  %v2309_v5 = vld [vmem:[%s3448_s1 + $0x20] ss:$8 sps:$4 sm:$0xff]  }
   0x3   :  { %846 = vmatpush1.bf16.msra.mxu0 %v2303_v1  ;;  %v2310_v6 = vld [vmem:[%s3448_s1 + $0x34] ss:$8 sps:$4 sm:$0xff]   ;;  %v2312_v7 = vld [vmem:[%s3448_s1 + $0x30] ss:$8 sps:$4 sm:$0xff]   ;;  %v2313_v8 = vld [vmem:[%s3448_s1 + $0x44] ss:$8 sps:$4 sm:$0xff]  }
   0x4   :  { %847 = vmatprep.subr.bf16.mxu0 %v2304_v2  ;;  %v2315_v9 = vld [vmem:[%s3448_s1 + $0x40] ss:$8 sps:$4 sm:$0xff]   ;;  %v2316_v10 = vld [vmem:[%s3448_s1 + $0x54] ss:$8 sps:$4 sm:$0xff]   ;;  %v2318_v11 = vld [vmem:[%s3448_s1 + $0x50] ss:$8 sps:$4 sm:$0xff]  }
   0x5   :  { %v2319_v12 = vld [vmem:[%s3448_s1 + $0x64] ss:$8 sps:$4 sm:$0xff]   ;;  %v2321_v15 = vld [vmem:[%s3448_s1 + $0x60] ss:$8 sps:$4 sm:$0xff]   ;;  %v2322_v16 = vld [vmem:[%s3448_s1 + $0x74] ss:$8 sps:$4 sm:$0xff]  }
   0x6   :  { %v33_v13 = vld [vmem:[%s3449_s0] sm:$0xff]  ;;  %v2324_v17 = vld [vmem:[%s3448_s1 + $0x70] ss:$8 sps:$4 sm:$0xff]   ;;  %v2328_v20 = vld [vmem:[%s3448_s1 + $0x94] ss:$8 sps:$4 sm:$0xff]  }
   0x7   :  { %848 = vmatpush1.bf16.msra.mxu0 %v2306_v3  ;;  %v1971_v14 = vcombine.high %v33_v13, %v33_v13  ;;  %v2325_v18 = vld [vmem:[%s3448_s1 + $0x84] ss:$8 sps:$4 sm:$0xff]   ;;  %v2327_v19 = vld [vmem:[%s3448_s1 + $0x80] ss:$8 sps:$4 sm:$0xff]   ;;  %v2330_v21 = vld [vmem:[%s3448_s1 + $0x90] ss:$8 sps:$4 sm:$0xff]   ;;  %v1970_v36 = vcombine.low %v33_v13, %v33_v13 }
   0x8   :  { %849 = vmatprep.subr.bf16.mxu0 %v2307_v4  ;;  %v2331_v22 = vld [vmem:[%s3448_s1 + $0xa4] ss:$8 sps:$4 sm:$0xff]   ;;  %v2333_v23 = vld [vmem:[%s3448_s1 + $0xa0] ss:$8 sps:$4 sm:$0xff]   ;;  %v2334_v24 = vld [vmem:[%s3448_s1 + $0xb4] ss:$8 sps:$4 sm:$0xff]  }
   0x9   :  { %877 = vmatprep.mubr.bf16.mxu0 %v1971_v14  ;;  %v2336_v25 = vld [vmem:[%s3448_s1 + $0xb0] ss:$8 sps:$4 sm:$0xff]   ;;  %v2337_v26 = vld [vmem:[%s3448_s1 + $0xc4] ss:$8 sps:$4 sm:$0xff]   ;;  %v2339_v27 = vld [vmem:[%s3448_s1 + $0xc0] ss:$8 sps:$4 sm:$0xff]  }
   0xa   :  { %v2340_v28 = vld [vmem:[%s3448_s1 + $0xd4] ss:$8 sps:$4 sm:$0xff]   ;;  %v2342_v29 = vld [vmem:[%s3448_s1 + $0xd0] ss:$8 sps:$4 sm:$0xff]   ;;  %v2343_v30 = vld [vmem:[%s3448_s1 + $0xe4] ss:$8 sps:$4 sm:$0xff]  }
   0xb   :  { %850 = vmatpush1.bf16.msra.mxu0 %v2309_v5  ;;  %v2345_v31 = vld [vmem:[%s3448_s1 + $0xe0] ss:$8 sps:$4 sm:$0xff]   ;;  %v2346_v32 = vld [vmem:[%s3448_s1 + $0xf4] ss:$8 sps:$4 sm:$0xff]   ;;  %v2348_v33 = vld [vmem:[%s3448_s1 + $0xf0] ss:$8 sps:$4 sm:$0xff]  }
   0xc   :  { %851 = vmatprep.subr.bf16.mxu0 %v2310_v6  ;;  %v2353_v34 = vld [vmem:[%s3448_s1 + $0x104] ss:$8 sps:$4 sm:$0xff]   ;;  %v2351_v37 = vld [vmem:[%s3448_s1 + $0x100] ss:$8 sps:$4 sm:$0xff]   ;;  %v2356_v39 = vld [vmem:[%s3448_s1 + $0x114] ss:$8 sps:$4 sm:$0xff]  }
   0xd   :  { %v2794_v35 = vld [vmem:[%s3449_s0 + $0x8] sm:$0xff]  ;;  %v2354_v40 = vld [vmem:[%s3448_s1 + $0x110] ss:$8 sps:$4 sm:$0xff]   ;;  %v2362_v43 = vld [vmem:[%s3448_s1 + $0x134] ss:$8 sps:$4 sm:$0xff]  }
   0xe   :  { %v1973_v38 = vcombine.high %v2794_v35, %v2794_v35  ;;  %v2359_v41 = vld [vmem:[%s3448_s1 + $0x124] ss:$8 sps:$4 sm:$0xff]   ;;  %v2357_v42 = vld [vmem:[%s3448_s1 + $0x120] ss:$8 sps:$4 sm:$0xff]   ;;  %v2360_v44 = vld [vmem:[%s3448_s1 + $0x130] ss:$8 sps:$4 sm:$0xff]  }
   0xf   :  { %852 = vmatpush1.bf16.msra.mxu0 %v2312_v7  ;;  %v2365_v45 = vld [vmem:[%s3448_s1 + $0x144] ss:$8 sps:$4 sm:$0xff]   ;;  %v2363_v46 = vld [vmem:[%s3448_s1 + $0x140] ss:$8 sps:$4 sm:$0xff]   ;;  %v2368_v47 = vld [vmem:[%s3448_s1 + $0x154] ss:$8 sps:$4 sm:$0xff]   ;;  %v1972_v7 = vcombine.low %v2794_v35, %v2794_v35 }
  0x10   :  { %853 = vmatprep.subr.bf16.mxu0 %v2313_v8  ;;  %v2366_v48 = vld [vmem:[%s3448_s1 + $0x150] ss:$8 sps:$4 sm:$0xff]   ;;  %v2371_v49 = vld [vmem:[%s3448_s1 + $0x164] ss:$8 sps:$4 sm:$0xff]   ;;  %v2369_v50 = vld [vmem:[%s3448_s1 + $0x160] ss:$8 sps:$4 sm:$0xff]  }
  0x11   :  { %v2374_v51 = vld [vmem:[%s3448_s1 + $0x174] ss:$8 sps:$4 sm:$0xff]   ;;  %v2372_v52 = vld [vmem:[%s3448_s1 + $0x170] ss:$8 sps:$4 sm:$0xff]   ;;  %v2377_v53 = vld [vmem:[%s3448_s1 + $0x184] ss:$8 sps:$4 sm:$0xff]  }
  0x12   :  { %v2375_v54 = vld [vmem:[%s3448_s1 + $0x180] ss:$8 sps:$4 sm:$0xff]   ;;  %v2380_v55 = vld [vmem:[%s3448_s1 + $0x194] ss:$8 sps:$4 sm:$0xff]   ;;  %v2378_v56 = vld [vmem:[%s3448_s1 + $0x190] ss:$8 sps:$4 sm:$0xff]  }
  0x13   :  { %854 = vmatpush1.bf16.msra.mxu0 %v2315_v9  ;;  %v2383_v57 = vld [vmem:[%s3448_s1 + $0x1a4] ss:$8 sps:$4 sm:$0xff]   ;;  %v2381_v58 = vld [vmem:[%s3448_s1 + $0x1a0] ss:$8 sps:$4 sm:$0xff]   ;;  %v2386_v59 = vld [vmem:[%s3448_s1 + $0x1b4] ss:$8 sps:$4 sm:$0xff]  }
  0x14   :  { %855 = vmatprep.subr.bf16.mxu0 %v2316_v10  ;;  %v2384_v60 = vld [vmem:[%s3448_s1 + $0x1b0] ss:$8 sps:$4 sm:$0xff]   ;;  %v2389_v61 = vld [vmem:[%s3448_s1 + $0x1c4] ss:$8 sps:$4 sm:$0xff]   ;;  %v2387_v62 = vld [vmem:[%s3448_s1 + $0x1c0] ss:$8 sps:$4 sm:$0xff]  }
  0x15   :  { %v2392_v63 = vld [vmem:[%s3448_s1 + $0x1d4] ss:$8 sps:$4 sm:$0xff]   ;;  %v2390_v0 = vld [vmem:[%s3448_s1 + $0x1d0] ss:$8 sps:$4 sm:$0xff]   ;;  %v2395_v1 = vld [vmem:[%s3448_s1 + $0x1e4] ss:$8 sps:$4 sm:$0xff]  }
  0x16   :  { %v2393_v2 = vld [vmem:[%s3448_s1 + $0x1e0] ss:$8 sps:$4 sm:$0xff]   ;;  %v2398_v3 = vld [vmem:[%s3448_s1 + $0x1f4] ss:$8 sps:$4 sm:$0xff]   ;;  %v2396_v4 = vld [vmem:[%s3448_s1 + $0x1f0] ss:$8 sps:$4 sm:$0xff]  }
  0x17   :  { %856 = vmatpush1.bf16.msra.mxu0 %v2318_v11  ;;  %v2403_v5 = vld [vmem:[%s3448_s1 + $0x204] ss:$8 sps:$4 sm:$0xff]   ;;  %v2897_v6 = vld [vmem:[%s3449_s0 + $0x10] sm:$0xff]  ;;  %v2401_v8 = vld [vmem:[%s3448_s1 + $0x200] ss:$8 sps:$4 sm:$0xff]  }
  0x18   :  { %857 = vmatprep.subr.bf16.mxu0 %v2319_v12  ;;  %v1975_v9 = vcombine.high %v2897_v6, %v2897_v6  ;;  %v2406_v10 = vld [vmem:[%s3448_s1 + $0x214] ss:$8 sps:$4 sm:$0xff]   ;;  %v2404_v11 = vld [vmem:[%s3448_s1 + $0x210] ss:$8 sps:$4 sm:$0xff]   ;;  %v2409_v12 = vld [vmem:[%s3448_s1 + $0x224] ss:$8 sps:$4 sm:$0xff]  }
  0x19   :  { %v2501_v13 = vld [vmem:[%s3450_s3 + $0x4] ss:$16 sps:$4 sm:$0xff]   ;;  %v2503_v14 = vld [vmem:[%s3450_s3] ss:$16 sps:$4 sm:$0xff]  }
  0x1a   :  { %1419 = vmatprep.subr.bf16.mxu1 %v2501_v13  ;;  %v2424_v35 = vld [vmem:[%s3448_s1 + $0x274] ss:$8 sps:$4 sm:$0xff]  }
  0x1b   :  { %858 = vmatpush1.bf16.msra.mxu0 %v2321_v15  ;;  %v2504_v15 = vld [vmem:[%s3450_s3 + $0x24] ss:$16 sps:$4 sm:$0xff]   ;;  %1420 = vmatpush1.bf16.msra.mxu1 %v2503_v14  ;;  %v2460_v14 = vld [vmem:[%s3448_s1 + $0x330] ss:$8 sps:$4 sm:$0xff]  }
  0x1c   :  { %859 = vmatprep.subr.bf16.mxu0 %v2322_v16  ;;  %v2407_v16 = vld [vmem:[%s3448_s1 + $0x220] ss:$8 sps:$4 sm:$0xff]   ;;  %1421 = vmatprep.subr.bf16.mxu1 %v2504_v15  ;;  %v2462_v13 = vld [vmem:[%s3448_s1 + $0x334] ss:$8 sps:$4 sm:$0xff]   ;;  %v2465_v15 = vld [vmem:[%s3448_s1 + $0x344] ss:$8 sps:$4 sm:$0xff]  }
  0x1f   :  { %860 = vmatpush1.bf16.msra.mxu0 %v2324_v17  ;;  %v2506_v17 = vld [vmem:[%s3450_s3 + $0x20] ss:$16 sps:$4 sm:$0xff]  }
  0x20   :  { %861 = vmatprep.subr.bf16.mxu0 %v2325_v18  ;;  %v2507_v18 = vld [vmem:[%s3450_s3 + $0x44] ss:$16 sps:$4 sm:$0xff]   ;;  %1422 = vmatpush1.bf16.msra.mxu1 %v2506_v17 }
  0x21   :  { %1423 = vmatprep.subr.bf16.mxu1 %v2507_v18  ;;  %v2468_v17 = vld [vmem:[%s3448_s1 + $0x354] ss:$8 sps:$4 sm:$0xff]   ;;  %v2466_v18 = vld [vmem:[%s3448_s1 + $0x350] ss:$8 sps:$4 sm:$0xff]  }
  0x23   :  { %862 = vmatpush1.bf16.msra.mxu0 %v2327_v19  ;;  %v2412_v19 = vld [vmem:[%s3448_s1 + $0x234] ss:$8 sps:$4 sm:$0xff]  }
  0x24   :  { %863 = vmatprep.subr.bf16.mxu0 %v2328_v20  ;;  %v2410_v20 = vld [vmem:[%s3448_s1 + $0x230] ss:$8 sps:$4 sm:$0xff]  }
  0x27   :  { %864 = vmatpush1.bf16.msra.mxu0 %v2330_v21  ;;  %v2509_v21 = vld [vmem:[%s3450_s3 + $0x40] ss:$16 sps:$4 sm:$0xff]  }
  0x28   :  { %865 = vmatprep.subr.bf16.mxu0 %v2331_v22  ;;  %v2510_v22 = vld [vmem:[%s3450_s3 + $0x64] ss:$16 sps:$4 sm:$0xff]   ;;  %1424 = vmatpush1.bf16.msra.mxu1 %v2509_v21 }
  0x29   :  { %1425 = vmatprep.subr.bf16.mxu1 %v2510_v22  ;;  %v2474_v21 = vld [vmem:[%s3448_s1 + $0x374] ss:$8 sps:$4 sm:$0xff]   ;;  %v2472_v22 = vld [vmem:[%s3448_s1 + $0x370] ss:$8 sps:$4 sm:$0xff]  }
  0x2b   :  { %866 = vmatpush1.bf16.msra.mxu0 %v2333_v23  ;;  %v2415_v23 = vld [vmem:[%s3448_s1 + $0x244] ss:$8 sps:$4 sm:$0xff]  }
  0x2c   :  { %867 = vmatprep.subr.bf16.mxu0 %v2334_v24  ;;  %v2413_v24 = vld [vmem:[%s3448_s1 + $0x240] ss:$8 sps:$4 sm:$0xff]  }
  0x2f   :  { %868 = vmatpush1.bf16.msra.mxu0 %v2336_v25  ;;  %v2512_v25 = vld [vmem:[%s3450_s3 + $0x60] ss:$16 sps:$4 sm:$0xff]  }
  0x30   :  { %869 = vmatprep.subr.bf16.mxu0 %v2337_v26  ;;  %v2513_v26 = vld [vmem:[%s3450_s3 + $0x84] ss:$16 sps:$4 sm:$0xff]   ;;  %1426 = vmatpush1.bf16.msra.mxu1 %v2512_v25 }
  0x31   :  { %1427 = vmatprep.subr.bf16.mxu1 %v2513_v26  ;;  %v2480_v25 = vld [vmem:[%s3448_s1 + $0x394] ss:$8 sps:$4 sm:$0xff]   ;;  %v2478_v26 = vld [vmem:[%s3448_s1 + $0x390] ss:$8 sps:$4 sm:$0xff]  }
  0x33   :  { %870 = vmatpush1.bf16.msra.mxu0 %v2339_v27  ;;  %v2418_v27 = vld [vmem:[%s3448_s1 + $0x254] ss:$8 sps:$4 sm:$0xff]  }
  0x34   :  { %871 = vmatprep.subr.bf16.mxu0 %v2340_v28  ;;  %v2416_v28 = vld [vmem:[%s3448_s1 + $0x250] ss:$8 sps:$4 sm:$0xff]  }
  0x37   :  { %872 = vmatpush1.bf16.msra.mxu0 %v2342_v29  ;;  %v2515_v29 = vld [vmem:[%s3450_s3 + $0x80] ss:$16 sps:$4 sm:$0xff]  }
  0x38   :  { %873 = vmatprep.subr.bf16.mxu0 %v2343_v30  ;;  %v2516_v30 = vld [vmem:[%s3450_s3 + $0xa4] ss:$16 sps:$4 sm:$0xff]   ;;  %1428 = vmatpush1.bf16.msra.mxu1 %v2515_v29 }
  0x39   :  { %1429 = vmatprep.subr.bf16.mxu1 %v2516_v30  ;;  %v2486_v29 = vld [vmem:[%s3448_s1 + $0x3b4] ss:$8 sps:$4 sm:$0xff]   ;;  %v2484_v30 = vld [vmem:[%s3448_s1 + $0x3b0] ss:$8 sps:$4 sm:$0xff]  }
  0x3b   :  { %874 = vmatpush1.bf16.msra.mxu0 %v2345_v31  ;;  %v2421_v31 = vld [vmem:[%s3448_s1 + $0x264] ss:$8 sps:$4 sm:$0xff]  }
  0x3c   :  { %875 = vmatprep.subr.bf16.mxu0 %v2346_v32  ;;  %v2419_v32 = vld [vmem:[%s3448_s1 + $0x260] ss:$8 sps:$4 sm:$0xff]  }
  0x3f   :  { %876 = vmatpush1.bf16.msra.mxu0 %v2348_v33  ;;  %v2518_v33 = vld [vmem:[%s3450_s3 + $0xa0] ss:$16 sps:$4 sm:$0xff]  }
  0x40   :  { %886 = vmatprep.subr.bf16.mxu0 %v2353_v34  ;;  %v2519_v34 = vld [vmem:[%s3450_s3 + $0xc4] ss:$16 sps:$4 sm:$0xff]   ;;  %1430 = vmatpush1.bf16.msra.mxu1 %v2518_v33 }
  0x41   :  { %1431 = vmatprep.subr.bf16.mxu1 %v2519_v34  ;;  %v2492_v33 = vld [vmem:[%s3448_s1 + $0x3d4] ss:$8 sps:$4 sm:$0xff]   ;;  %v2490_v34 = vld [vmem:[%s3448_s1 + $0x3d0] ss:$8 sps:$4 sm:$0xff]  }
  0x42   :  { %878 = vmatmul.mubr.bf16.vlgmr.msra.gmra.mrb[0].mxu0 %v1970_v36  ;;  %v2521_v36 = vld [vmem:[%s3450_s3 + $0xc0] ss:$16 sps:$4 sm:$0xff]  }
  0x43   :  { %887 = vmatpush1.bf16.msra.mxu0 %v2351_v37  ;;  %918 = vmatprep.mubr.bf16.mxu0 %v1973_v38  ;;  %v2422_v37 = vld [vmem:[%s3448_s1 + $0x270] ss:$8 sps:$4 sm:$0xff]   ;;  %v2522_v38 = vld [vmem:[%s3450_s3 + $0xe4] ss:$16 sps:$4 sm:$0xff]  }
  0x44   :  { %888 = vmatprep.subr.bf16.mxu0 %v2356_v39  ;;  %v2427_v39 = vld [vmem:[%s3448_s1 + $0x284] ss:$8 sps:$4 sm:$0xff]   ;;  %1432 = vmatpush1.bf16.msra.mxu1 %v2521_v36  ;;  %v2493_v36 = vld [vmem:[%s3448_s1 + $0x3e0] ss:$8 sps:$4 sm:$0xff]  }
  0x45   :  { %1433 = vmatprep.subr.bf16.mxu1 %v2522_v38  ;;  %v2496_v38 = vld [vmem:[%s3448_s1 + $0x3f0] ss:$8 sps:$4 sm:$0xff]  }
  0x47   :  { %889 = vmatpush1.bf16.msra.mxu0 %v2354_v40  ;;  %v2524_v40 = vld [vmem:[%s3450_s3 + $0xe0] ss:$16 sps:$4 sm:$0xff]  }
  0x48   :  { %890 = vmatprep.subr.bf16.mxu0 %v2359_v41  ;;  %v2425_v41 = vld [vmem:[%s3448_s1 + $0x280] ss:$8 sps:$4 sm:$0xff]   ;;  %1434 = vmatpush1.bf16.msra.mxu1 %v2524_v40  ;;  %v2543_v40 = vld [vmem:[%s3450_s3 + $0x1c4] ss:$16 sps:$4 sm:$0xff]  }
  0x4b   :  { %891 = vmatpush1.bf16.msra.mxu0 %v2357_v42  ;;  %v2525_v42 = vld [vmem:[%s3450_s3 + $0x104] ss:$16 sps:$4 sm:$0xff]  }
  0x4c   :  { %892 = vmatprep.subr.bf16.mxu0 %v2362_v43  ;;  %v2430_v43 = vld [vmem:[%s3448_s1 + $0x294] ss:$8 sps:$4 sm:$0xff]   ;;  %1435 = vmatprep.subr.bf16.mxu1 %v2525_v42 }
  0x4d   :  { %v2546_v42 = vld [vmem:[%s3450_s3 + $0x1e4] ss:$16 sps:$4 sm:$0xff]  }
  0x4f   :  { %893 = vmatpush1.bf16.msra.mxu0 %v2360_v44  ;;  %v2527_v44 = vld [vmem:[%s3450_s3 + $0x100] ss:$16 sps:$4 sm:$0xff]  }
  0x50   :  { %894 = vmatprep.subr.bf16.mxu0 %v2365_v45  ;;  %v2428_v45 = vld [vmem:[%s3448_s1 + $0x290] ss:$8 sps:$4 sm:$0xff]   ;;  %1436 = vmatpush1.bf16.msra.mxu1 %v2527_v44  ;;  %v2551_v44 = vld [vmem:[%s3450_s3 + $0xc] ss:$16 sps:$4 sm:$0xff]  }
  0x53   :  { %895 = vmatpush1.bf16.msra.mxu0 %v2363_v46  ;;  %v2528_v46 = vld [vmem:[%s3450_s3 + $0x124] ss:$16 sps:$4 sm:$0xff]  }
  0x54   :  { %896 = vmatprep.subr.bf16.mxu0 %v2368_v47  ;;  %v2433_v47 = vld [vmem:[%s3448_s1 + $0x2a4] ss:$8 sps:$4 sm:$0xff]   ;;  %1437 = vmatprep.subr.bf16.mxu1 %v2528_v46 }
  0x57   :  { %897 = vmatpush1.bf16.msra.mxu0 %v2366_v48  ;;  %v2530_v48 = vld [vmem:[%s3450_s3 + $0x120] ss:$16 sps:$4 sm:$0xff]  }
  0x58   :  { %898 = vmatprep.subr.bf16.mxu0 %v2371_v49  ;;  %v2431_v49 = vld [vmem:[%s3448_s1 + $0x2a0] ss:$8 sps:$4 sm:$0xff]   ;;  %1438 = vmatpush1.bf16.msra.mxu1 %v2530_v48 }
  0x59   :  { %v165_v48 = vld [vmem:[%s3452_s2] sm:$0x3] }
  0x5b   :  { %899 = vmatpush1.bf16.msra.mxu0 %v2369_v50  ;;  %v2531_v50 = vld [vmem:[%s3450_s3 + $0x144] ss:$16 sps:$4 sm:$0xff]  }
  0x5c   :  { %900 = vmatprep.subr.bf16.mxu0 %v2374_v51  ;;  %v2436_v51 = vld [vmem:[%s3448_s1 + $0x2b4] ss:$8 sps:$4 sm:$0xff]   ;;  %1439 = vmatprep.subr.bf16.mxu1 %v2531_v50 }
  0x5f   :  { %901 = vmatpush1.bf16.msra.mxu0 %v2372_v52  ;;  %v2533_v52 = vld [vmem:[%s3450_s3 + $0x140] ss:$16 sps:$4 sm:$0xff]  }
  0x60   :  { %902 = vmatprep.subr.bf16.mxu0 %v2377_v53  ;;  %v2434_v53 = vld [vmem:[%s3448_s1 + $0x2b0] ss:$8 sps:$4 sm:$0xff]   ;;  %1440 = vmatpush1.bf16.msra.mxu1 %v2533_v52 }
  0x63   :  { %903 = vmatpush1.bf16.msra.mxu0 %v2375_v54  ;;  %v2534_v54 = vld [vmem:[%s3450_s3 + $0x164] ss:$16 sps:$4 sm:$0xff]  }
  0x64   :  { %904 = vmatprep.subr.bf16.mxu0 %v2380_v55  ;;  %v2439_v55 = vld [vmem:[%s3448_s1 + $0x2c4] ss:$8 sps:$4 sm:$0xff]   ;;  %1441 = vmatprep.subr.bf16.mxu1 %v2534_v54 }
  0x67   :  { %905 = vmatpush1.bf16.msra.mxu0 %v2378_v56  ;;  %v2536_v56 = vld [vmem:[%s3450_s3 + $0x160] ss:$16 sps:$4 sm:$0xff]  }
  0x68   :  { %906 = vmatprep.subr.bf16.mxu0 %v2383_v57  ;;  %v2437_v57 = vld [vmem:[%s3448_s1 + $0x2c0] ss:$8 sps:$4 sm:$0xff]   ;;  %1442 = vmatpush1.bf16.msra.mxu1 %v2536_v56 }
  0x6b   :  { %907 = vmatpush1.bf16.msra.mxu0 %v2381_v58  ;;  %v2537_v58 = vld [vmem:[%s3450_s3 + $0x184] ss:$16 sps:$4 sm:$0xff]  }
  0x6c   :  { %908 = vmatprep.subr.bf16.mxu0 %v2386_v59  ;;  %v2442_v59 = vld [vmem:[%s3448_s1 + $0x2d4] ss:$8 sps:$4 sm:$0xff]   ;;  %1443 = vmatprep.subr.bf16.mxu1 %v2537_v58 }
  0x6f   :  { %909 = vmatpush1.bf16.msra.mxu0 %v2384_v60  ;;  %v2539_v60 = vld [vmem:[%s3450_s3 + $0x180] ss:$16 sps:$4 sm:$0xff]  }
  0x70   :  { %910 = vmatprep.subr.bf16.mxu0 %v2389_v61  ;;  %v2440_v61 = vld [vmem:[%s3448_s1 + $0x2d0] ss:$8 sps:$4 sm:$0xff]   ;;  %1444 = vmatpush1.bf16.msra.mxu1 %v2539_v60 }
  0x73   :  { %911 = vmatpush1.bf16.msra.mxu0 %v2387_v62  ;;  %v2540_v62 = vld [vmem:[%s3450_s3 + $0x1a4] ss:$16 sps:$4 sm:$0xff]  }
  0x74   :  { %912 = vmatprep.subr.bf16.mxu0 %v2392_v63  ;;  %v2445_v63 = vld [vmem:[%s3448_s1 + $0x2e4] ss:$8 sps:$4 sm:$0xff]   ;;  %1445 = vmatprep.subr.bf16.mxu1 %v2540_v62 }
  0x77   :  { %913 = vmatpush1.bf16.msra.mxu0 %v2390_v0  ;;  %v2542_v0 = vld [vmem:[%s3450_s3 + $0x1a0] ss:$16 sps:$4 sm:$0xff]  }
  0x78   :  { %914 = vmatprep.subr.bf16.mxu0 %v2395_v1  ;;  %v2443_v1 = vld [vmem:[%s3448_s1 + $0x2e0] ss:$8 sps:$4 sm:$0xff]   ;;  %1446 = vmatpush1.bf16.msra.mxu1 %v2542_v0 }
  0x79   :  { %1447 = vmatprep.subr.bf16.mxu1 %v2543_v40  ;;  %v2552_v0 = vld [vmem:[%s3450_s3 + $0x28] ss:$16 sps:$4 sm:$0xff]  }
  0x7a   :  { %v2608_v40 = vld [vmem:[%s3451_s5 + $0x28] sm:$0xff]  }
  0x7b   :  { %915 = vmatpush1.bf16.msra.mxu0 %v2393_v2  ;;  %v2448_v2 = vld [vmem:[%s3448_s1 + $0x2f4] ss:$8 sps:$4 sm:$0xff]  }
  0x7c   :  { %916 = vmatprep.subr.bf16.mxu0 %v2398_v3  ;;  %v2446_v3 = vld [vmem:[%s3448_s1 + $0x2f0] ss:$8 sps:$4 sm:$0xff]  }
  0x7f   :  { %917 = vmatpush1.bf16.msra.mxu0 %v2396_v4  ;;  %v2453_v4 = vld [vmem:[%s3448_s1 + $0x304] ss:$8 sps:$4 sm:$0xff]  }
  0x80   :  { %927 = vmatprep.subr.bf16.mxu0 %v2403_v5  ;;  %v3086_v5 = vld [vmem:[%s3449_s0 + $0x18] sm:$0xff] }
  0x82   :  { %919 = vmatmul.mubr.bf16.vlgmr.msra.gmra.mrb[0].mxu0 %v1972_v7  ;;  %v1974_v7 = vcombine.low %v2897_v6, %v2897_v6  ;;  %v2459_v6 = vld [vmem:[%s3448_s1 + $0x324] ss:$8 sps:$4 sm:$0xff]  }
  0x83   :  { %928 = vmatpush1.bf16.msra.mxu0 %v2401_v8  ;;  %959 = vmatprep.mubr.bf16.mxu0 %v1975_v9  ;;  %v2451_v8 = vld [vmem:[%s3448_s1 + $0x300] ss:$8 sps:$4 sm:$0xff]   ;;  %v1977_v9 = vcombine.high %v3086_v5, %v3086_v5 }
  0x84   :  { %929 = vmatprep.subr.bf16.mxu0 %v2406_v10  ;;  %v2456_v10 = vld [vmem:[%s3448_s1 + $0x314] ss:$8 sps:$4 sm:$0xff]  }
  0x87   :  { %930 = vmatpush1.bf16.msra.mxu0 %v2404_v11  ;;  %v2454_v11 = vld [vmem:[%s3448_s1 + $0x310] ss:$8 sps:$4 sm:$0xff]  }
  0x88   :  { %931 = vmatprep.subr.bf16.mxu0 %v2409_v12  ;;  %v2457_v12 = vld [vmem:[%s3448_s1 + $0x320] ss:$8 sps:$4 sm:$0xff]  }
  0x8b   :  { %932 = vmatpush1.bf16.msra.mxu0 %v2407_v16  ;;  %v2463_v16 = vld [vmem:[%s3448_s1 + $0x340] ss:$8 sps:$4 sm:$0xff]  }
  0x8c   :  { %933 = vmatprep.subr.bf16.mxu0 %v2412_v19  ;;  %v2471_v19 = vld [vmem:[%s3448_s1 + $0x364] ss:$8 sps:$4 sm:$0xff]  }
  0x8f   :  { %934 = vmatpush1.bf16.msra.mxu0 %v2410_v20  ;;  %v2469_v20 = vld [vmem:[%s3448_s1 + $0x360] ss:$8 sps:$4 sm:$0xff]  }
  0x90   :  { %935 = vmatprep.subr.bf16.mxu0 %v2415_v23  ;;  %v2477_v23 = vld [vmem:[%s3448_s1 + $0x384] ss:$8 sps:$4 sm:$0xff]  }
  0x93   :  { %936 = vmatpush1.bf16.msra.mxu0 %v2413_v24  ;;  %v2475_v24 = vld [vmem:[%s3448_s1 + $0x380] ss:$8 sps:$4 sm:$0xff]  }
  0x94   :  { %937 = vmatprep.subr.bf16.mxu0 %v2418_v27  ;;  %v2483_v27 = vld [vmem:[%s3448_s1 + $0x3a4] ss:$8 sps:$4 sm:$0xff]  }
  0x97   :  { %938 = vmatpush1.bf16.msra.mxu0 %v2416_v28  ;;  %v2481_v28 = vld [vmem:[%s3448_s1 + $0x3a0] ss:$8 sps:$4 sm:$0xff]  }
  0x98   :  { %939 = vmatprep.subr.bf16.mxu0 %v2421_v31  ;;  %v2489_v31 = vld [vmem:[%s3448_s1 + $0x3c4] ss:$8 sps:$4 sm:$0xff]  }
  0x9b   :  { %940 = vmatpush1.bf16.msra.mxu0 %v2419_v32  ;;  %v2487_v32 = vld [vmem:[%s3448_s1 + $0x3c0] ss:$8 sps:$4 sm:$0xff]  }
  0x9c   :  { %941 = vmatprep.subr.bf16.mxu0 %v2424_v35  ;;  %v2495_v35 = vld [vmem:[%s3448_s1 + $0x3e4] ss:$8 sps:$4 sm:$0xff]  }
  0x9f   :  { %942 = vmatpush1.bf16.msra.mxu0 %v2422_v37  ;;  %v2498_v37 = vld [vmem:[%s3448_s1 + $0x3f4] ss:$8 sps:$4 sm:$0xff]  }
  0xa0   :  { %943 = vmatprep.subr.bf16.mxu0 %v2427_v39  ;;  %v1976_v39 = vcombine.low %v3086_v5, %v3086_v5  ;;  %v2563_v5 = vld [vmem:[%s3450_s3 + $0x8c] ss:$16 sps:$4 sm:$0xff]  }
  0xa3   :  { %944 = vmatpush1.bf16.msra.mxu0 %v2425_v41  ;;  %v2545_v41 = vld [vmem:[%s3450_s3 + $0x1c0] ss:$16 sps:$4 sm:$0xff]  }
  0xa4   :  { %945 = vmatprep.subr.bf16.mxu0 %v2430_v43  ;;  %1448 = vmatpush1.bf16.msra.mxu1 %v2545_v41  ;;  %v2548_v43 = vld [vmem:[%s3450_s3 + $0x1e0] ss:$16 sps:$4 sm:$0xff]  }
  0xa5   :  { %1449 = vmatprep.subr.bf16.mxu1 %v2546_v42  ;;  %v2609_v41 = vld [vmem:[%s3451_s5 + $0x70] sm:$0xff]  }
  0xa6   :  { %v2610_v42 = vld [vmem:[%s3451_s5 + $0x30] sm:$0xff]  }
  0xa7   :  { %946 = vmatpush1.bf16.msra.mxu0 %v2428_v45  ;;  %v167_v45 = vlaneseq }
  0xa8   :  { %947 = vmatprep.subr.bf16.mxu0 %v2433_v47  ;;  %1450 = vmatpush1.bf16.msra.mxu1 %v2548_v43  ;;  %v2611_v43 = vld [vmem:[%s3451_s5 + $0x78] sm:$0xff]  }
  0xa9   :  { %1460 = vmatprep.subr.bf16.mxu1 %v2551_v44  ;;  %v3202_v46 = vshrl.u32 %v167_v45, 7  ;;  %v2612_v44 = vld [vmem:[%s3451_s5 + $0x38] sm:$0xff]   ;;  %v2613_v45 = vld [vmem:[%s3451_s5 + $0xc0] sm:$0xff]  }
  0xab   :  { %948 = vmatpush1.bf16.msra.mxu0 %v2431_v49  ;;  %v169_v47 = vsub.s32 0, %v3202_v46  ;;  %v173_v49 = vsub.s32 1, %v3202_v46 }
  0xac   :  { %949 = vmatprep.subr.bf16.mxu0 %v2436_v51 }
  0xad   :  { %v170_v50 = vrot.slane %v165_v48, %v169_v47  ;;  %v174_v51 = vrot.slane %v165_v48, %v173_v49  ;;  %v1077_v48 = vld [vmem:[%s3453_s4] sm:$0xf] }
  0xaf   :  { %950 = vmatpush1.bf16.msra.mxu0 %v2434_v53 }
  0xb0   :  { %951 = vmatprep.subr.bf16.mxu0 %v2439_v55 }
  0xb3   :  { %952 = vmatpush1.bf16.msra.mxu0 %v2437_v57 }
  0xb4   :  { %953 = vmatprep.subr.bf16.mxu0 %v2442_v59 }
  0xb7   :  { %954 = vmatpush1.bf16.msra.mxu0 %v2440_v61  ;;  %v2549_v61 = vld [vmem:[%s3450_s3 + $0x8] ss:$16 sps:$4 sm:$0xff]  }
  0xb8   :  { %955 = vmatprep.subr.bf16.mxu0 %v2445_v63  ;;  %v2554_v63 = vld [vmem:[%s3450_s3 + $0x2c] ss:$16 sps:$4 sm:$0xff]  }
  0xbb   :  { %956 = vmatpush1.bf16.msra.mxu0 %v2443_v1  ;;  %v2557_v1 = vld [vmem:[%s3450_s3 + $0x4c] ss:$16 sps:$4 sm:$0xff]  }
  0xbc   :  { %957 = vmatprep.subr.bf16.mxu0 %v2448_v2  ;;  %v2555_v2 = vld [vmem:[%s3450_s3 + $0x48] ss:$16 sps:$4 sm:$0xff]  }
  0xbf   :  { %958 = vmatpush1.bf16.msra.mxu0 %v2446_v3  ;;  %v2560_v3 = vld [vmem:[%s3450_s3 + $0x6c] ss:$16 sps:$4 sm:$0xff]  }
  0xc0   :  { %968 = vmatprep.subr.bf16.mxu0 %v2453_v4  ;;  %v2558_v4 = vld [vmem:[%s3450_s3 + $0x68] ss:$16 sps:$4 sm:$0xff]  }
  0xc2   :  { %960 = vmatmul.mubr.bf16.vlgmr.msra.gmra.mrb[0].mxu0 %v1974_v7  ;;  %v2561_v7 = vld [vmem:[%s3450_s3 + $0x88] ss:$16 sps:$4 sm:$0xff]  }
  0xc3   :  { %969 = vmatpush1.bf16.msra.mxu0 %v2451_v8  ;;  %1000 = vmatprep.mubr.bf16.mxu0 %v1977_v9  ;;  %v2566_v8 = vld [vmem:[%s3450_s3 + $0xac] ss:$16 sps:$4 sm:$0xff]   ;;  %v2564_v9 = vld [vmem:[%s3450_s3 + $0xa8] ss:$16 sps:$4 sm:$0xff]  }
  0xc4   :  { %970 = vmatprep.subr.bf16.mxu0 %v2456_v10  ;;  %v2569_v10 = vld [vmem:[%s3450_s3 + $0xcc] ss:$16 sps:$4 sm:$0xff]  }
  0xc7   :  { %971 = vmatpush1.bf16.msra.mxu0 %v2454_v11  ;;  %v2567_v11 = vld [vmem:[%s3450_s3 + $0xc8] ss:$16 sps:$4 sm:$0xff]  }
  0xc8   :  { %972 = vmatprep.subr.bf16.mxu0 %v2459_v6  ;;  %v2572_v6 = vld [vmem:[%s3450_s3 + $0xec] ss:$16 sps:$4 sm:$0xff]  }
  0xcb   :  { %973 = vmatpush1.bf16.msra.mxu0 %v2457_v12  ;;  %v2570_v12 = vld [vmem:[%s3450_s3 + $0xe8] ss:$16 sps:$4 sm:$0xff]  }
  0xcc   :  { %974 = vmatprep.subr.bf16.mxu0 %v2462_v13  ;;  %v2575_v13 = vld [vmem:[%s3450_s3 + $0x10c] ss:$16 sps:$4 sm:$0xff]  }
  0xcf   :  { %975 = vmatpush1.bf16.msra.mxu0 %v2460_v14  ;;  %v2573_v14 = vld [vmem:[%s3450_s3 + $0x108] ss:$16 sps:$4 sm:$0xff]  }
  0xd0   :  { %976 = vmatprep.subr.bf16.mxu0 %v2465_v15  ;;  %v2578_v15 = vld [vmem:[%s3450_s3 + $0x12c] ss:$16 sps:$4 sm:$0xff]  }
  0xd3   :  { %977 = vmatpush1.bf16.msra.mxu0 %v2463_v16  ;;  %v2576_v16 = vld [vmem:[%s3450_s3 + $0x128] ss:$16 sps:$4 sm:$0xff]  }
  0xd4   :  { %978 = vmatprep.subr.bf16.mxu0 %v2468_v17  ;;  %v2581_v17 = vld [vmem:[%s3450_s3 + $0x14c] ss:$16 sps:$4 sm:$0xff]  }
  0xd7   :  { %979 = vmatpush1.bf16.msra.mxu0 %v2466_v18  ;;  %v2579_v18 = vld [vmem:[%s3450_s3 + $0x148] ss:$16 sps:$4 sm:$0xff]  }
  0xd8   :  { %980 = vmatprep.subr.bf16.mxu0 %v2471_v19  ;;  %v2584_v19 = vld [vmem:[%s3450_s3 + $0x16c] ss:$16 sps:$4 sm:$0xff]  }
  0xdb   :  { %981 = vmatpush1.bf16.msra.mxu0 %v2469_v20  ;;  %v2582_v20 = vld [vmem:[%s3450_s3 + $0x168] ss:$16 sps:$4 sm:$0xff]  }
  0xdc   :  { %982 = vmatprep.subr.bf16.mxu0 %v2474_v21  ;;  %v2587_v21 = vld [vmem:[%s3450_s3 + $0x18c] ss:$16 sps:$4 sm:$0xff]  }
  0xdf   :  { %983 = vmatpush1.bf16.msra.mxu0 %v2472_v22  ;;  %v2585_v22 = vld [vmem:[%s3450_s3 + $0x188] ss:$16 sps:$4 sm:$0xff]  }
  0xe0   :  { %984 = vmatprep.subr.bf16.mxu0 %v2477_v23  ;;  %v2590_v23 = vld [vmem:[%s3450_s3 + $0x1ac] ss:$16 sps:$4 sm:$0xff]  }
  0xe3   :  { %985 = vmatpush1.bf16.msra.mxu0 %v2475_v24  ;;  %v2588_v24 = vld [vmem:[%s3450_s3 + $0x1a8] ss:$16 sps:$4 sm:$0xff]  }
  0xe4   :  { %986 = vmatprep.subr.bf16.mxu0 %v2480_v25  ;;  %v2593_v25 = vld [vmem:[%s3450_s3 + $0x1cc] ss:$16 sps:$4 sm:$0xff]  }
  0xe7   :  { %987 = vmatpush1.bf16.msra.mxu0 %v2478_v26  ;;  %v2591_v26 = vld [vmem:[%s3450_s3 + $0x1c8] ss:$16 sps:$4 sm:$0xff]  }
  0xe8   :  { %988 = vmatprep.subr.bf16.mxu0 %v2483_v27  ;;  %v2596_v27 = vld [vmem:[%s3450_s3 + $0x1ec] ss:$16 sps:$4 sm:$0xff]  }
  0xeb   :  { %989 = vmatpush1.bf16.msra.mxu0 %v2481_v28  ;;  %v2594_v28 = vld [vmem:[%s3450_s3 + $0x1e8] ss:$16 sps:$4 sm:$0xff]  }
  0xec   :  { %990 = vmatprep.subr.bf16.mxu0 %v2486_v29  ;;  %v2597_v29 = vld [vmem:[%s3451_s5 + $0x40] sm:$0xff]  }
  0xef   :  { %991 = vmatpush1.bf16.msra.mxu0 %v2484_v30  ;;  %v2598_v30 = vld [vmem:[%s3451_s5] sm:$0xff]  }
  0xf0   :  { %992 = vmatprep.subr.bf16.mxu0 %v2489_v31  ;;  %v2599_v31 = vld [vmem:[%s3451_s5 + $0x48] sm:$0xff]  }
  0xf3   :  { %993 = vmatpush1.bf16.msra.mxu0 %v2487_v32  ;;  %v2600_v32 = vld [vmem:[%s3451_s5 + $0x8] sm:$0xff]  }
  0xf4   :  { %994 = vmatprep.subr.bf16.mxu0 %v2492_v33  ;;  %v2601_v33 = vld [vmem:[%s3451_s5 + $0x50] sm:$0xff]  }
  0xf7   :  { %995 = vmatpush1.bf16.msra.mxu0 %v2490_v34  ;;  %v2602_v34 = vld [vmem:[%s3451_s5 + $0x10] sm:$0xff]  }
  0xf8   :  { %996 = vmatprep.subr.bf16.mxu0 %v2495_v35  ;;  %v2603_v35 = vld [vmem:[%s3451_s5 + $0x58] sm:$0xff]  }
  0xfb   :  { %997 = vmatpush1.bf16.msra.mxu0 %v2493_v36  ;;  %v2604_v36 = vld [vmem:[%s3451_s5 + $0x18] sm:$0xff]  }
  0xfc   :  { %998 = vmatprep.subr.bf16.mxu0 %v2498_v37  ;;  %v2605_v37 = vld [vmem:[%s3451_s5 + $0x60] sm:$0xff]  }
  0xff   :  { %999 = vmatpush1.bf16.msra.mxu0 %v2496_v38  ;;  %v2606_v38 = vld [vmem:[%s3451_s5 + $0x20] sm:$0xff]  }
 0x102   :  { %1001 = vmatmul.mubr.bf16.vlgmr.msra.gmra.mrb[0].mxu0 %v1976_v39  ;;  %v2607_v39 = vld [vmem:[%s3451_s5 + $0x68] sm:$0xff]  }
 0x1d5   :  { %v1002_v52 = vpop.f32.mrb[0].mxu0 }
 0x1d6   :  { %v2285_v53 = vadd.f32 %v1002_v52, %v170_v50  ;;  %v1004_v54 = vpop.f32.mrb[1].mxu0  ;;  %v1082_v50 = vrot.slane %v1077_v48, %v169_v47  ;;  %v2615_v47 = vld [vmem:[%s3451_s5 + $0xc8] sm:$0xff]  }
 0x1d7   :  { %v2286_v55 = vadd.f32 %v1004_v54, %v174_v51  ;;  %v1006_v56 = vpop.f32.mrb[2].mxu0  ;;  %v1086_v51 = vrot.slane %v1077_v48, %v173_v49  ;;  %v2616_v49 = vld [vmem:[%s3451_s5 + $0x88] sm:$0xff]  }
 0x1d8   :  { %v1009_v57 = vmax.f32 %v2285_v53, 0.0  ;;  %v1007_v58 = vpop.f32.mrb[3].mxu0 }
 0x1d9   :  { %v1010_v59 = vmax.f32 %v2286_v55, 0.0 }
 0x1da   :  { %v3216_v62 = vpack.c.bf16 %v1009_v57, %v1009_v57 }
 0x1db   :  { %v1012_v60 = vpack.c.bf16 %v1010_v59, %v1010_v59 }
 0x1dd   :  { %1451 = vmatprep.mubr.bf16.mxu1 %v1012_v60 }
 0x1de   :  { %1452 = vmatmul.mubr.bf16.vlgmr.msra.gmra.mrb[0].mxu1 %v3216_v62 }
 0x1df   :  { %1461 = vmatpush1.bf16.msra.mxu1 %v2549_v61  ;;  %1492 = vmatprep.mubr.bf16.mxu1 %v1012_v60  ;;  %v2614_v61 = vld [vmem:[%s3451_s5 + $0x80] sm:$0xff]  }
 0x1e0   :  { %1462 = vmatprep.subr.bf16.mxu1 %v2554_v63  ;;  %v2617_v63 = vld [vmem:[%s3451_s5 + $0xd0] sm:$0xff]  }
 0x1e3   :  { %1463 = vmatpush1.bf16.msra.mxu1 %v2552_v0  ;;  %v2618_v0 = vld [vmem:[%s3451_s5 + $0x90] sm:$0xff]  }
 0x1e4   :  { %1464 = vmatprep.subr.bf16.mxu1 %v2557_v1  ;;  %v2619_v1 = vld [vmem:[%s3451_s5 + $0xd8] sm:$0xff]  }
 0x1e7   :  { %1465 = vmatpush1.bf16.msra.mxu1 %v2555_v2  ;;  %v2620_v2 = vld [vmem:[%s3451_s5 + $0x98] sm:$0xff]  }
 0x1e8   :  { %1466 = vmatprep.subr.bf16.mxu1 %v2560_v3  ;;  %v2621_v3 = vld [vmem:[%s3451_s5 + $0xe0] sm:$0xff]  }
 0x1eb   :  { %1467 = vmatpush1.bf16.msra.mxu1 %v2558_v4  ;;  %v2622_v4 = vld [vmem:[%s3451_s5 + $0xa0] sm:$0xff]  }
 0x1ec   :  { %1468 = vmatprep.subr.bf16.mxu1 %v2563_v5  ;;  %v2623_v5 = vld [vmem:[%s3451_s5 + $0xe8] sm:$0xff]  }
 0x1ef   :  { %1469 = vmatpush1.bf16.msra.mxu1 %v2561_v7  ;;  %v2624_v7 = vld [vmem:[%s3451_s5 + $0xa8] sm:$0xff]  }
 0x1f0   :  { %1470 = vmatprep.subr.bf16.mxu1 %v2566_v8  ;;  %v2625_v8 = vld [vmem:[%s3451_s5 + $0xf0] sm:$0xff]  }
 0x1f3   :  { %1471 = vmatpush1.bf16.msra.mxu1 %v2564_v9  ;;  %v2626_v9 = vld [vmem:[%s3451_s5 + $0xb0] sm:$0xff]  }
 0x1f4   :  { %1472 = vmatprep.subr.bf16.mxu1 %v2569_v10  ;;  %v2627_v10 = vld [vmem:[%s3451_s5 + $0xf8] sm:$0xff]  }
 0x1f7   :  { %1473 = vmatpush1.bf16.msra.mxu1 %v2567_v11  ;;  %v2628_v11 = vld [vmem:[%s3451_s5 + $0xb8] sm:$0xff]  }
 0x1f8   :  { %1474 = vmatprep.subr.bf16.mxu1 %v2572_v6  ;;  %v1089_v6 = vsub.s32 2, %v3202_v46 }
 0x1fb   :  { %1475 = vmatpush1.bf16.msra.mxu1 %v2570_v12  ;;  %v1093_v12 = vsub.s32 3, %v3202_v46  ;;  %v2629_v46 = vld [vmem:[%s3454_s7] sm:$0xff]  }
 0x1fc   :  { %1476 = vmatprep.subr.bf16.mxu1 %v2575_v13  ;;  %v1090_v13 = vrot.slane %v1077_v48, %v1089_v6 }
 0x1ff   :  { %1477 = vmatpush1.bf16.msra.mxu1 %v2573_v14  ;;  %v1094_v14 = vrot.slane %v1077_v48, %v1093_v12 }
 0x200   :  { %1478 = vmatprep.subr.bf16.mxu1 %v2578_v15 }
 0x203   :  { %1479 = vmatpush1.bf16.msra.mxu1 %v2576_v16 }
 0x204   :  { %1480 = vmatprep.subr.bf16.mxu1 %v2581_v17 }
 0x207   :  { %1481 = vmatpush1.bf16.msra.mxu1 %v2579_v18 }
 0x208   :  { %1482 = vmatprep.subr.bf16.mxu1 %v2584_v19 }
 0x20b   :  { %1483 = vmatpush1.bf16.msra.mxu1 %v2582_v20 }
 0x20c   :  { %1484 = vmatprep.subr.bf16.mxu1 %v2587_v21 }
 0x20f   :  { %1485 = vmatpush1.bf16.msra.mxu1 %v2585_v22 }
 0x210   :  { %1486 = vmatprep.subr.bf16.mxu1 %v2590_v23 }
 0x213   :  { %1487 = vmatpush1.bf16.msra.mxu1 %v2588_v24 }
 0x214   :  { %1488 = vmatprep.subr.bf16.mxu1 %v2593_v25  ;;  %v2637_v25 = vmov 0.0  }
 0x217   :  { %1489 = vmatpush1.bf16.msra.mxu1 %v2591_v26  ;;  %v2630_v26 = vld [vmem:[%s3454_s7 + $0x8] sm:$0xff]  }
 0x218   :  { %1490 = vmatprep.subr.bf16.mxu1 %v2596_v27  ;;  %v2631_v27 = vld [vmem:[%s3454_s7 + $0x10] sm:$0xff]  }
 0x21b   :  { %1491 = vmatpush1.bf16.msra.mxu1 %v2594_v28  ;;  %v2632_v28 = vld [vmem:[%s3454_s7 + $0x18] sm:$0xff]  }
 0x21c   :  { %2212 = vmatprep.subr.bf16.mxu1 %v2597_v29  ;;  %v2633_v29 = vld [vmem:[%s3454_s7 + $0x20] sm:$0xff]  }
 0x21e   :  { %1493 = vmatmul.mubr.bf16.vlgmr.msra.gmra.mrb[4].mxu1 %v3216_v62 }
 0x21f   :  { %2213 = vmatpush3.bf16.msra.mxu1 %v2598_v30  ;;  %v2634_v30 = vld [vmem:[%s3454_s7 + $0x28] sm:$0xff]  }
 0x220   :  { %2214 = vmatprep.subr.bf16.mxu1 %v2599_v31  ;;  %v2635_v31 = vld [vmem:[%s3454_s7 + $0x30] sm:$0xff]  }
 0x223   :  { %2215 = vmatpush3.bf16.msra.mxu1 %v2600_v32  ;;  %v2636_v32 = vld [vmem:[%s3454_s7 + $0x38] sm:$0xff]  }
 0x224   :  { %2216 = vmatprep.subr.bf16.mxu1 %v2601_v33 }
 0x227   :  { %2217 = vmatpush3.bf16.msra.mxu1 %v2602_v34 }
 0x228   :  { %2218 = vmatprep.subr.bf16.mxu1 %v2603_v35 }
 0x22b   :  { %2219 = vmatpush3.bf16.msra.mxu1 %v2604_v36 }
 0x22c   :  { %2220 = vmatprep.subr.bf16.mxu1 %v2605_v37 }
 0x22f   :  { %2221 = vmatpush3.bf16.msra.mxu1 %v2606_v38  ;;  %v2170_v38 = vld [vmem:[%s3455_s6] ss:$0 sm:$0xff] }
 0x230   :  { %2222 = vmatprep.subr.bf16.mxu1 %v2607_v39 }
 0x233   :  { %2223 = vmatpush3.bf16.msra.mxu1 %v2608_v40 }
 0x234   :  { %2224 = vmatprep.subr.bf16.mxu1 %v2609_v41 }
 0x237   :  { %2225 = vmatpush3.bf16.msra.mxu1 %v2610_v42 }
 0x238   :  { %2226 = vmatprep.subr.bf16.mxu1 %v2611_v43 }
 0x23b   :  { %2227 = vmatpush3.bf16.msra.mxu1 %v2612_v44 }
 0x23c   :  { %2234 = vmatprep.subr.bf16.mxu1 %v2613_v45 }
 0x2b1   :  { %v1453_v52 = vpop.f32.mrb[0].mxu1 }
 0x2b2   :  { %v1454_v53 = vadd.f32 %v1453_v52, %v1082_v50  ;;  %v1455_v54 = vpop.f32.mrb[1].mxu1 }
 0x2b3   :  { %v1456_v55 = vadd.f32 %v1455_v54, %v1086_v51  ;;  %v1457_v56 = vpop.f32.mrb[2].mxu1  ;;  %v2203_v51 = vld [vmem:[%s3456_s8] ss:$0 sm:$0xff] }
 0x2b4   :  { %v1501_v57 = vmax.f32 %v1454_v53, 0.0  ;;  %v1458_v58 = vpop.f32.mrb[3].mxu1 }
 0x2b5   :  { %v1502_v59 = vmax.f32 %v1456_v55, 0.0 }
 0x2b6   :  { %v1505_v62 = vpack.c.bf16 %v1501_v57, %v1501_v57 }
 0x2b7   :  { %v1506_v60 = vpack.c.bf16 %v1502_v59, %v1502_v59 }
 0x2b9   :  { %1804 = vmatprep.mubr.bf16.mxu1 %v1506_v60 }
 0x2ba   :  { %1805 = vmatmul.mubr.bf16.vlgmr.msra.gmra.mrb[8].mxu1 %v1505_v62 }
 0x2bb   :  { %2235 = vmatpush3.bf16.msra.mxu1 %v2614_v61 }
 0x2bc   :  { %2236 = vmatprep.subr.bf16.mxu1 %v2615_v47 }
 0x2bf   :  { %2237 = vmatpush3.bf16.msra.mxu1 %v2616_v49 }
 0x2c0   :  { %2238 = vmatprep.subr.bf16.mxu1 %v2617_v63 }
 0x2c3   :  { %2239 = vmatpush3.bf16.msra.mxu1 %v2618_v0 }
 0x2c4   :  { %2240 = vmatprep.subr.bf16.mxu1 %v2619_v1 }
 0x2c7   :  { %2241 = vmatpush3.bf16.msra.mxu1 %v2620_v2 }
 0x2c8   :  { %2242 = vmatprep.subr.bf16.mxu1 %v2621_v3 }
 0x2cb   :  { %2243 = vmatpush3.bf16.msra.mxu1 %v2622_v4 }
 0x2cc   :  { %2244 = vmatprep.subr.bf16.mxu1 %v2623_v5 }
 0x2cf   :  { %2245 = vmatpush3.bf16.msra.mxu1 %v2624_v7 }
 0x2d0   :  { %2246 = vmatprep.subr.bf16.mxu1 %v2625_v8 }
 0x2d3   :  { %2247 = vmatpush3.bf16.msra.mxu1 %v2626_v9 }
 0x2d4   :  { %2248 = vmatprep.subr.bf16.mxu1 %v2627_v10 }
 0x2d7   :  { %2249 = vmatpush3.bf16.msra.mxu1 %v2628_v11 }
 0x2d8   :  { %2265 = vmatprep.subr.bf16.mxu1 %v2637_v25 }
 0x2f1   :  { %v1494_v15 = vpop.f32.mrb[4].mxu1 }
 0x2f2   :  { %v1495_v16 = vadd.f32 %v1494_v15, %v1090_v13  ;;  %v1496_v17 = vpop.f32.mrb[5].mxu1 }
 0x2f3   :  { %v1497_v18 = vadd.f32 %v1496_v17, %v1094_v14  ;;  %v1498_v19 = vpop.f32.mrb[6].mxu1 }
 0x2f4   :  { %v1503_v20 = vmax.f32 %v1495_v16, 0.0  ;;  %v1499_v21 = vpop.f32.mrb[7].mxu1 }
 0x2f5   :  { %v1504_v22 = vmax.f32 %v1497_v18, 0.0 }
 0x2f6   :  { %v1507_v24 = vpack.c.bf16 %v1503_v20, %v1503_v20 }
 0x2f7   :  { %v1508_v23 = vpack.c.bf16 %v1504_v22, %v1504_v22 }
 0x2f9   :  { %1844 = vmatprep.mubr.bf16.mxu1 %v1508_v23 }
 0x2fa   :  { %1845 = vmatmul.mubr.bf16.vlgmr.msra.gmra.mrb[12].mxu1 %v1507_v24 }
 0x2fb   :  { %2266 = vmatpush3.bf16.msra.mxu1 %v2629_v46  ;;  %2281 = vmatprep.mubr.msk.bf16.mxu1 %vm2638_vm0, %v2637_v25 }
 0x2fc   :  { %2267 = vmatprep.subr.bf16.mxu1 %v2637_v25 }
 0x2ff   :  { %2268 = vmatpush3.bf16.msra.mxu1 %v2630_v26 }
 0x300   :  { %2269 = vmatprep.subr.bf16.mxu1 %v2637_v25 }
 0x303   :  { %2270 = vmatpush3.bf16.msra.mxu1 %v2631_v27 }
 0x304   :  { %2271 = vmatprep.subr.bf16.mxu1 %v2637_v25 }
 0x307   :  { %2272 = vmatpush3.bf16.msra.mxu1 %v2632_v28 }
 0x308   :  { %2273 = vmatprep.subr.bf16.mxu1 %v2637_v25 }
 0x30b   :  { %2274 = vmatpush3.bf16.msra.mxu1 %v2633_v29 }
 0x30c   :  { %2275 = vmatprep.subr.bf16.mxu1 %v2637_v25 }
 0x30f   :  { %2276 = vmatpush3.bf16.msra.mxu1 %v2634_v30 }
 0x310   :  { %2277 = vmatprep.subr.bf16.mxu1 %v2637_v25 }
 0x313   :  { %2278 = vmatpush3.bf16.msra.mxu1 %v2635_v31 }
 0x314   :  { %2279 = vmatprep.subr.bf16.mxu1 %v2637_v25 }
 0x317   :  { %2280 = vmatpush3.bf16.msra.mxu1 %v2636_v32 }
 0x38d   :  { %v2228_v33 = vpop.f32.mrb[8].mxu1 }
 0x38e   :  { %v2229_v34 = vpop.f32.mrb[9].mxu1 }
 0x38f   :  { %v2230_v35 = vadd.f32 %v2229_v34, %v2228_v33  ;;  %v2231_v36 = vpop.f32.mrb[10].mxu1 }
 0x390   :  { %v2232_v37 = vpop.f32.mrb[11].mxu1 }
 0x391   :  { %v1807_v41 = vadd.f32 %v2230_v35, %v2170_v38 }
 0x3cd   :  { %v2250_v39 = vpop.f32.mrb[12].mxu1 }
 0x3ce   :  { %v2251_v40 = vpop.f32.mrb[13].mxu1 }
 0x3cf   :  { %v2252_v42 = vadd.f32 %v2251_v40, %v2250_v39  ;;  %v2253_v43 = vpop.f32.mrb[14].mxu1 }
 0x3d0   :  { %v2254_v44 = vpop.f32.mrb[15].mxu1 }
 0x3d1   :  { %v1847_v45 = vadd.f32 %v2252_v42, %v1807_v41 }
 0x3d3   :  { %v1852_v48 = vmax.f32 %v1847_v45, 0.0 }
 0x3d5   :  { %v1853_v50 = vpack.c.bf16 %v1852_v48, %v1852_v48 }
 0x3d7   :  { %2282 = vmatmul.mubr.bf16.vlgmr.msra.gmra.mrb[16].mxu1 %v1853_v50 }
 0x4aa   :  { %v1959_v52 = vpop.f32.mrb[16].mxu1 }
 0x4ab   :  { %v1960_v53 = vadd.f32 %v2203_v51, %v1959_v52  ;;  %v2283_v54 = vpop.f32.mrb[17].mxu1 }
 0x4ac   :  { %v1962_v55 = vpop.f32.mrb[18].mxu1 }
 0x4ad   :  { %1965 = vst [vmem:[%s3457_s9] sm:$0xff] %v1960_v53  ;;  %v2284_v56 = vpop.f32.mrb[19].mxu1 }

</bundles_post_ra>
